<compile_context>
chip_gen: v6e
topology: v6e:2x2x1
jax: 0.10.0
libtpu: 0.0.40
codegen_flags: <defaults>
</compile_context>

<pallas_src>
import functools

import jax
import jax.numpy as jnp
from jax.experimental import pallas as pl
from jax.experimental.pallas import tpu as pltpu

C_IN = 80
C_HID = 64
C_OUT = 96
PAD_LEN = 1          # kernel_size = pad_len + 1 = 2
PAD_VALUE = -60.0    # F.pad(x, (1, 0), value=-60.0)
NEG_SLOPE = 0.01     # LeakyReLU default
LANE = 128
TL_MAX = 2048        # L-tile cap (multiple of 128)


def readout_kernel(x_ref, corr_ref, wa_ref, wb_ref, b1_ref, w2_ref, b2_ref, o_ref):
    # x_ref:    (1, C_IN, TL)     raw (un-normalized) input tile, NCL layout
    # corr_ref: (1, 1, C_HID, 1)  Wa @ halo column (previous tile's last col / pad value)
    # wa/wb:    (C_HID, C_IN)     conv1 taps 0 / 1, pre-scaled by 1/80
    # b1:       (C_HID, 1)        conv1 bias with the +60/80 term folded in
    # w2:       (C_OUT, C_HID)    conv2 weight;  b2: (C_OUT, 1)
    # o_ref:    (1, C_OUT, TL)
    x = x_ref[0]                                                  # (C_IN, TL)

    ha = jnp.dot(wa_ref[...], x, preferred_element_type=jnp.float32)   # tap 0 (unshifted)
    hb = jnp.dot(wb_ref[...], x, preferred_element_type=jnp.float32)   # tap 1

    # tap 0 needs x[:, l-1]; roll the *result* right by one lane (roll commutes with the
    # channel contraction), then overwrite the wrapped lane 0 with the precomputed halo
    # contribution.
    ha = pltpu.roll(ha, shift=1, axis=1)                          # XLU, overlaps MXU
    lane = jax.lax.broadcasted_iota(jnp.int32, ha.shape, 1)
    ha = jnp.where(lane == 0, corr_ref[0, 0], ha)                 # (C_HID, 1) broadcasts

    h = ha + hb + b1_ref[...]                                     # (C_HID, TL)
    h = jnp.where(h > 0, h, NEG_SLOPE * h)                        # LeakyReLU
    y = jnp.dot(w2_ref[...], h, preferred_element_type=jnp.float32) + b2_ref[...]
    o_ref[0] = y.astype(o_ref.dtype)                              # lane-dense store


def _choose_tiling(L, tl_max):
    """Pick (tile_len, padded_len): tile multiple of 128, padded_len % tile == 0."""
    cap = max(int(tl_max) // LANE, 1)
    l128 = pl.cdiv(L, LANE) * LANE
    n128 = l128 // LANE
    d = max(k for k in range(1, min(cap, n128) + 1) if n128 % k == 0)
    if d == n128 or d * LANE >= 512:
        return d * LANE, l128              # pad <= 127 columns (0 if L % 128 == 0)
    # Awkward length (divisor rule forces tiny tiles): accept a bounded right pad
    # to get a reasonably large tile.
    tl = min(cap, 4) * LANE                # 512 (or tl_max if smaller)
    return tl, pl.cdiv(L, tl) * tl


@functools.partial(jax.jit, static_argnames=("tl_max",))
def readout_forward(x, params, *, tl_max=TL_MAX):
    """x: (N, C_IN, L) float32 (PyTorch NCL layout). Returns (N, C_OUT, L)."""
    w1, b1, w2, b2 = params["w1"], params["b1"], params["w2"], params["b2"]
    N, C, L = x.shape
    assert C == C_IN
    hi = jax.lax.Precision.HIGHEST

    # Fold the (x + 60)/80 normalization into conv1 (exact, linear):
    #   sum_ct W[o,c,t] * (xp[c,t]+60)/80
    #     = sum_ct (W/80)[o,c,t] * xp[c,t] + (60/80) * sum_ct W[o,c,t]
    wa = w1[:, :, 0] * (1.0 / 80.0)                               # (C_HID, C_IN)
    wb = w1[:, :, 1] * (1.0 / 80.0)                               # (C_HID, C_IN)
    b1f = (b1 + (60.0 / 80.0) * (w1[:, :, 0] + w1[:, :, 1]).sum(axis=1))
    b1f = b1f.reshape(C_HID, 1)
    w2m = w2[:, :, 0]                                             # (C_OUT, C_HID)
    b2f = b2.reshape(C_OUT, 1)

    tl, l_pad = _choose_tiling(L, tl_max)
    n_tiles = l_pad // tl
    xp = x if l_pad == L else jnp.pad(
        x, ((0, 0), (0, 0), (0, l_pad - L)), constant_values=PAD_VALUE)

    # Per-tile halo column (tiny): tile 0 gets the conv pad value (-60), whose folded
    # normalized contribution is exactly 0; tile j>0 gets x[:, j*tl - 1].  Precompute
    # its conv1 tap-0 contribution so the kernel only fixes lane 0 of a (C_HID, TL) map.
    if n_tiles > 1:
        boundary = x[:, :, tl - 1::tl][:, :, : n_tiles - 1]       # (N, C_IN, n_tiles-1)
        halo = jnp.concatenate(
            [jnp.full((N, C_IN, 1), PAD_VALUE, x.dtype), boundary], axis=-1)
    else:
        halo = jnp.full((N, C_IN, 1), PAD_VALUE, x.dtype)
    corr = jnp.einsum("hc,ncj->njh", wa, halo, precision=hi)[..., None]  # (N,nt,C_HID,1)

    out = pl.pallas_call(
        readout_kernel,
        out_shape=jax.ShapeDtypeStruct((N, C_OUT, l_pad), jnp.float32),
        grid_spec=pltpu.PrefetchScalarGridSpec(
            num_scalar_prefetch=0,
            grid=(N, n_tiles),
            in_specs=[
                pl.BlockSpec((1, C_IN, tl), lambda n, j: (n, 0, j)),
                pl.BlockSpec((1, 1, C_HID, 1), lambda n, j: (n, j, 0, 0)),
                pl.BlockSpec((C_HID, C_IN), lambda n, j: (0, 0)),
                pl.BlockSpec((C_HID, C_IN), lambda n, j: (0, 0)),
                pl.BlockSpec((C_HID, 1), lambda n, j: (0, 0)),
                pl.BlockSpec((C_OUT, C_HID), lambda n, j: (0, 0)),
                pl.BlockSpec((C_OUT, 1), lambda n, j: (0, 0)),
            ],
            out_specs=pl.BlockSpec((1, C_OUT, tl), lambda n, j: (n, 0, j)),
        ),
        compiler_params=pltpu.CompilerParams(
            dimension_semantics=("parallel", "parallel")),
    )(xp, corr, wa, wb, b1f, w2m, b2f)

    return out if l_pad == L else out[:, :, :L]


def readout_reference(x, params):
    """Pure-JAX reference matching the PyTorch module (for correctness checking)."""
    hi = jax.lax.Precision.HIGHEST
    xp = jnp.pad(x, ((0, 0), (0, 0), (PAD_LEN, 0)), constant_values=PAD_VALUE)
    xn = (xp + 60.0) / 80.0
    h = (jnp.einsum("oc,nct->not", params["w1"][:, :, 0], xn[:, :, :-1], precision=hi)
         + jnp.einsum("oc,nct->not", params["w1"][:, :, 1], xn[:, :, 1:], precision=hi)
         + params["b1"][None, :, None])
    h = jnp.where(h > 0, h, NEG_SLOPE * h)
    return (jnp.einsum("oc,nct->not", params["w2"][:, :, 0], h, precision=hi)
            + params["b2"][None, :, None])


def init_params(key):
    """Deterministic init mirroring nn.Conv1d default (uniform +/- 1/sqrt(fan_in))."""
    k1, k2, k3, k4 = jax.random.split(key, 4)
    bound1 = 1.0 / jnp.sqrt(C_IN * (PAD_LEN + 1))
    bound2 = 1.0 / jnp.sqrt(C_HID * 1)
    return {
        "w1": jax.random.uniform(k1, (C_HID, C_IN, PAD_LEN + 1),
                                 jnp.float32, -bound1, bound1),
        "b1": jax.random.uniform(k2, (C_HID,), jnp.float32, -bound1, bound1),
        "w2": jax.random.uniform(k3, (C_OUT, C_HID, 1),
                                 jnp.float32, -bound2, bound2),
        "b2": jax.random.uniform(k4, (C_OUT,), jnp.float32, -bound2, bound2),
    }


if __name__ == "__main__":
    key = jax.random.PRNGKey(0)
    kp, kx1, kx2 = jax.random.split(key, 3)
    params = init_params(kp)

    # membrane-voltage-like inputs around -60 mV
    N, L = 2, 128
    x = -60.0 + 10.0 * jax.random.normal(kx1, (N, C_IN, L), jnp.float32)

    out = readout_forward(x, params)                      # single tile, no padding path
    jax.block_until_ready(out)
    assert out.shape == (N, C_OUT, L)
    ref = readout_reference(x, params)
    err = float(jnp.max(jnp.abs(out - ref)))
    assert jnp.allclose(out, ref, rtol=5e-3, atol=5e-3), err

    # second config exercises multi-tile halo + right-padding path (L % 128 != 0)
    L2 = 300
    x2 = -60.0 + 10.0 * jax.random.normal(kx2, (N, C_IN, L2), jnp.float32)
    out2 = readout_forward(x2, params, tl_max=128)        # forces 3 tiles of 128
    jax.block_until_ready(out2)
    assert out2.shape == (N, C_OUT, L2)
    ref2 = readout_reference(x2, params)
    err2 = float(jnp.max(jnp.abs(out2 - ref2)))
    assert jnp.allclose(out2, ref2, rtol=5e-3, atol=5e-3), err2

    print("KERNEL_OK")
</pallas_src>

<mosaic_0001>
module attributes {stable_mosaic.version = 11 : i64} {
  func.func @readout_kernel(%arg0: i32, %arg1: i32, %arg2: memref<1x80x128xf32, #tpu.memory_space<vmem>>, %arg3: memref<1x1x64x1xf32, #tpu.memory_space<vmem>>, %arg4: memref<64x80xf32, #tpu.memory_space<vmem>>, %arg5: memref<64x80xf32, #tpu.memory_space<vmem>>, %arg6: memref<64x1xf32, #tpu.memory_space<vmem>>, %arg7: memref<96x64xf32, #tpu.memory_space<vmem>>, %arg8: memref<96x1xf32, #tpu.memory_space<vmem>>, %arg9: memref<1x96x128xf32, #tpu.memory_space<vmem>>) attributes {dimension_semantics = [#tpu.dimension_semantics<parallel>, #tpu.dimension_semantics<parallel>], iteration_bounds = array<i64: 2, 1>, scalar_prefetch = 0 : i64, scratch_operands = 0 : i64, tpu.core_type = #tpu.core_type<tc>, window_params = [{transform_indices = @transform_0, window_bounds = array<i64: 1, 80, 128>}, {transform_indices = @transform_1, window_bounds = array<i64: 1, 1, 64, 1>}, {pipeline_mode = #tpu.pipeline_mode<synchronous>, transform_indices = @transform_2, window_bounds = array<i64: 64, 80>}, {pipeline_mode = #tpu.pipeline_mode<synchronous>, transform_indices = @transform_3, window_bounds = array<i64: 64, 80>}, {pipeline_mode = #tpu.pipeline_mode<synchronous>, transform_indices = @transform_4, window_bounds = array<i64: 64, 1>}, {pipeline_mode = #tpu.pipeline_mode<synchronous>, transform_indices = @transform_5, window_bounds = array<i64: 96, 64>}, {pipeline_mode = #tpu.pipeline_mode<synchronous>, transform_indices = @transform_6, window_bounds = array<i64: 96, 1>}, {transform_indices = @transform_7, window_bounds = array<i64: 1, 96, 128>}]} {
    %c0 = arith.constant 0 : index
    %c0_0 = arith.constant 0 : index
    %c0_1 = arith.constant 0 : index
    %0 = vector.load %arg2[%c0, %c0_0, %c0_1] : memref<1x80x128xf32, #tpu.memory_space<vmem>>, vector<1x80x128xf32>
    %1 = vector.shape_cast %0 : vector<1x80x128xf32> to vector<80x128xf32>
    %c0_2 = arith.constant 0 : index
    %c0_3 = arith.constant 0 : index
    %2 = vector.load %arg4[%c0_2, %c0_3] : memref<64x80xf32, #tpu.memory_space<vmem>>, vector<64x80xf32>
    %cst = arith.constant dense<0.000000e+00> : vector<64x128xf32>
    %3 = tpu.matmul %2, %1, %cst {dimension_numbers = #tpu.dot_dimension_numbers<[1], [0], [0], [1], [0, 0, 1, 1], [], []>} : vector<64x80xf32>, vector<80x128xf32>, vector<64x128xf32> -> vector<64x128xf32>
    %c0_4 = arith.constant 0 : index
    %c0_5 = arith.constant 0 : index
    %4 = vector.load %arg5[%c0_4, %c0_5] : memref<64x80xf32, #tpu.memory_space<vmem>>, vector<64x80xf32>
    %cst_6 = arith.constant dense<0.000000e+00> : vector<64x128xf32>
    %5 = tpu.matmul %4, %1, %cst_6 {dimension_numbers = #tpu.dot_dimension_numbers<[1], [0], [0], [1], [0, 0, 1, 1], [], []>} : vector<64x80xf32>, vector<80x128xf32>, vector<64x128xf32> -> vector<64x128xf32>
    %c1_i32 = arith.constant 1 : i32
    %6 = tpu.dynamic_rotate %3 by %c1_i32 dim 1 : vector<64x128xf32>, i32 -> vector<64x128xf32>
    %7 = tpu.iota {dimensions = array<i32: 1>} : vector<64x128xi32>
    %c0_i32 = arith.constant 0 : i32
    %8 = vector.broadcast %c0_i32 : i32 to vector<64x128xi32>
    %9 = arith.cmpi eq, %7, %8 : vector<64x128xi32>
    %c0_7 = arith.constant 0 : index
    %c0_8 = arith.constant 0 : index
    %c0_9 = arith.constant 0 : index
    %c0_10 = arith.constant 0 : index
    %10 = vector.load %arg3[%c0_7, %c0_8, %c0_9, %c0_10] : memref<1x1x64x1xf32, #tpu.memory_space<vmem>>, vector<1x1x64x1xf32>
    %11 = vector.shape_cast %10 : vector<1x1x64x1xf32> to vector<64x1xf32>
    %12 = vector.shape_cast %11 : vector<64x1xf32> to vector<64x1xf32>
    %13 = vector.broadcast %12 : vector<64x1xf32> to vector<64x128xf32>
    %14 = arith.select %9, %13, %6 : vector<64x128xi1>, vector<64x128xf32>
    %15 = arith.addf %14, %5 : vector<64x128xf32>
    %c0_11 = arith.constant 0 : index
    %c0_12 = arith.constant 0 : index
    %16 = vector.load %arg6[%c0_11, %c0_12] : memref<64x1xf32, #tpu.memory_space<vmem>>, vector<64x1xf32>
    %17 = vector.broadcast %16 : vector<64x1xf32> to vector<64x128xf32>
    %18 = arith.addf %15, %17 : vector<64x128xf32>
    %cst_13 = arith.constant 0.000000e+00 : f32
    %19 = vector.broadcast %cst_13 : f32 to vector<64x128xf32>
    %20 = arith.cmpf ogt, %18, %19 : vector<64x128xf32>
    %cst_14 = arith.constant 0.00999999977 : f32
    %21 = vector.broadcast %cst_14 : f32 to vector<64x128xf32>
    %22 = arith.mulf %21, %18 : vector<64x128xf32>
    %23 = arith.select %20, %18, %22 : vector<64x128xi1>, vector<64x128xf32>
    %c0_15 = arith.constant 0 : index
    %c0_16 = arith.constant 0 : index
    %24 = vector.load %arg7[%c0_15, %c0_16] : memref<96x64xf32, #tpu.memory_space<vmem>>, vector<96x64xf32>
    %cst_17 = arith.constant dense<0.000000e+00> : vector<96x128xf32>
    %25 = tpu.matmul %24, %23, %cst_17 {dimension_numbers = #tpu.dot_dimension_numbers<[1], [0], [0], [1], [0, 0, 1, 1], [], []>} : vector<96x64xf32>, vector<64x128xf32>, vector<96x128xf32> -> vector<96x128xf32>
    %c0_18 = arith.constant 0 : index
    %c0_19 = arith.constant 0 : index
    %26 = vector.load %arg8[%c0_18, %c0_19] : memref<96x1xf32, #tpu.memory_space<vmem>>, vector<96x1xf32>
    %27 = vector.broadcast %26 : vector<96x1xf32> to vector<96x128xf32>
    %28 = arith.addf %25, %27 : vector<96x128xf32>
    %c0_20 = arith.constant 0 : index
    %c0_21 = arith.constant 0 : index
    %c0_22 = arith.constant 0 : index
    %29 = vector.load %arg9[%c0_20, %c0_21, %c0_22] : memref<1x96x128xf32, #tpu.memory_space<vmem>>, vector<1x96x128xf32>
    %30 = vector.shape_cast %29 : vector<1x96x128xf32> to vector<96x128xf32>
    %31 = vector.shape_cast %28 : vector<96x128xf32> to vector<1x96x128xf32>
    tpu.vector_store %arg9[%c0_20, %c0_21, %c0_22], %31 {strides = array<i32>} : memref<1x96x128xf32, #tpu.memory_space<vmem>>, vector<1x96x128xf32>,
    return
  }
  func.func @transform_0(%arg0: i32, %arg1: i32) -> (i32, i32, i32) {
    %c0_i32 = arith.constant 0 : i32
    %c0_i32_0 = arith.constant 0 : i32
    return %arg0, %c0_i32, %arg1 : i32, i32, i32
  }
  func.func @transform_1(%arg0: i32, %arg1: i32) -> (i32, i32, i32, i32) {
    %c0_i32 = arith.constant 0 : i32
    %c0_i32_0 = arith.constant 0 : i32
    %c0_i32_1 = arith.constant 0 : i32
    return %arg0, %arg1, %c0_i32, %c0_i32_0 : i32, i32, i32, i32
  }
  func.func @transform_2(%arg0: i32, %arg1: i32) -> (i32, i32) {
    %c0_i32 = arith.constant 0 : i32
    %c0_i32_0 = arith.constant 0 : i32
    %c0_i32_1 = arith.constant 0 : i32
    return %c0_i32, %c0_i32_0 : i32, i32
  }
  func.func @transform_3(%arg0: i32, %arg1: i32) -> (i32, i32) {
    %c0_i32 = arith.constant 0 : i32
    %c0_i32_0 = arith.constant 0 : i32
    %c0_i32_1 = arith.constant 0 : i32
    return %c0_i32, %c0_i32_0 : i32, i32
  }
  func.func @transform_4(%arg0: i32, %arg1: i32) -> (i32, i32) {
    %c0_i32 = arith.constant 0 : i32
    %c0_i32_0 = arith.constant 0 : i32
    %c0_i32_1 = arith.constant 0 : i32
    return %c0_i32, %c0_i32_0 : i32, i32
  }
  func.func @transform_5(%arg0: i32, %arg1: i32) -> (i32, i32) {
    %c0_i32 = arith.constant 0 : i32
    %c0_i32_0 = arith.constant 0 : i32
    %c0_i32_1 = arith.constant 0 : i32
    return %c0_i32, %c0_i32_0 : i32, i32
  }
  func.func @transform_6(%arg0: i32, %arg1: i32) -> (i32, i32) {
    %c0_i32 = arith.constant 0 : i32
    %c0_i32_0 = arith.constant 0 : i32
    %c0_i32_1 = arith.constant 0 : i32
    return %c0_i32, %c0_i32_0 : i32, i32
  }
  func.func @transform_7(%arg0: i32, %arg1: i32) -> (i32, i32, i32) {
    %c0_i32 = arith.constant 0 : i32
    %c0_i32_0 = arith.constant 0 : i32
    return %arg0, %c0_i32, %arg1 : i32, i32, i32
  }
}

</mosaic_0001>

<bundles_post_ra>
// kernel: readout_forward.1
= control target key start
LH: loop header
LB: loop body
LE: loop exit
PB: predicated region body
PF: predicated region fallthrough
CT: control target
= control target key end

     0   :  { %12 = vsyncpa [#allocation3], 0  ;;  %s1908_s0 = inlined_call_operand.vmem [shape: f32[2,80,128], index: 0, kind: input, shape index: {}]   ;;  %s1909_s1 = inlined_call_operand.vmem [shape: f32[2,1,64,1], index: 1, kind: input, shape index: {}]   ;;  %s1910_s2 = inlined_call_operand.vmem [shape: f32[64,80], index: 2, kind: input, shape index: {}]   ;;  %s1911_s3 = inlined_call_operand.vmem [shape: f32[64,80], index: 3, kind: input, shape index: {}]   ;;  %s1912_s4 = inlined_call_operand.vmem [shape: f32[64,1], index: 4, kind: input, shape index: {}]   ;;  %s1913_s5 = inlined_call_operand.vmem [shape: f32[96,64], index: 5, kind: input, shape index: {}]   ;;  %s1914_s6 = inlined_call_operand.vmem [shape: f32[96,1], index: 6, kind: input, shape index: {}]   ;;  %s1915_s7 = inlined_call_operand.hbm [shape: f32[2,96,128], index: 7, kind: output, shape index: {}]  }
   0x1   :  { %14 = vsyncpa [#allocation3 + $0x1], 0  ;;  %s1553_s24 = smov 0   ;;  %s1555_s25 = smov 0  }
   0x2   :  { %s1557_s26 = smov 0   ;;  %s1559_s27 = smov 0  }
   0x3   :  { %s1561_s28 = smov 0   ;;  %s1563_s29 = smov 0  }
   0x4 LB: > { %s1156_s30 = sadd.s32 4294967295, %s1506_s29   ;;  %s1157_s8 = sadd.s32 4294967294, %s1506_s29   ;;  %s1506_s29 = sphi %s1563_s29, %s20_s29   ;;  %s1502_s28 = sphi %s1561_s28, %s1922_s28   ;;  %s1498_s27 = sphi %s1559_s27, %s1921_s27   ;;  %s1494_s26 = sphi %s1557_s26, %s1920_s26   ;;  %s1490_s25 = sphi %s1555_s25, %s1919_s25   ;;  %s1486_s24 = sphi %s1553_s24, %s1918_s24  }
   0x5   : > { %s32_s9 = sadd.s32 1, %s1502_s28  ;;  %s202_s10 = sadd.s32 1, %s1494_s26 }
   0x6   : > { %p34_p0 = scmp.ge.s32.totalorder %s32_s9, 2  ;;  %p212_p1 = scmp.ne.s32.totalorder %s1494_s26, %s1490_s25 }
   0x7   : > { %p213_p2 = scmp.eq.s32.totalorder %s1156_s30, 1  ;;  %p218_p3 = scmp.ne.s32.totalorder %s1490_s25, %s1486_s24 }
   0x8   : > { %s1924_s9 = smov (%p34_p0, %s32_s9), 0  ;;  %p219_p5 = scmp.eq.s32.totalorder %s1157_s8, 1 }
   0x9   : > { %p1593_p4 = por %p213_p2, %p212_p1  ;;  %s197_s12 = ssub.s32 %s1502_s28, %s1924_s9 }
   0xa   : > { %p1160_p6 = scmp.ge.s32.totalorder %s1506_s29, 1  ;;  %p200_p7 = scmp.eq.s32.totalorder %s197_s12, 0 }
   0xb   : > { %p1600_p8 = por %p219_p5, %p218_p3  ;;  %p275_p9 = scmp.lt.s32.totalorder %s1506_s29, 3 }
   0xc   : > { %s1606_s14 = scalar_select %p200_p7, %s1494_s26, %s202_s10  }
   0xd   : > { %p276_p10 = pnand %p1160_p6, %p275_p9 }
   0xe   : > { %p319_p11 = scmp.lt.s32.totalorder (!%p276_p10), %s1498_s27, 1  ;;  %s1509_s19 = smov (!%p276_p10), 1  }
   0xf   : > { %279 = sbr.rel (%p276_p10) target bundleno = 613 (0x265), region = 48 }
  0x10   : > { %s1368_s23 = smul.u32 (!%p276_p10), 1536, %s1498_s27 }
  0x14   : > { %v346_v0 = vld [vmem:[%s1910_s2] sm:$0xff]  ;;  %vm354_vm0 = vcmask 654336   ;;  %v1508_v1 = vmov 0   ;;  %s320_s17 = scalar_select %p319_p11, %s1498_s27, 1  ;;  %v711_v3 = vld [vmem:[%s1912_s4 + $0x38] sm:$0xff]  ;;  %v347_v15 = vld [vmem:[%s1910_s2 + $0x8] sm:$0xff] }
  0x15   : > { %1272 = vmatprep.mubr.msk.f32.mxu0 %vm354_vm0, %v346_v0  ;;  %1428 = vset.pattern.permute.xlu1 %v1508_v1  ;;  %v484_v2 = vld [vmem:[%s1911_s3] sm:$0xff]  ;;  %v485_v16 = vld [vmem:[%s1911_s3 + $0x8] sm:$0xff]  ;;  %v348_v17 = vld [vmem:[%s1910_s2 + $0x10] sm:$0xff]  ;;  %vm868_vm1 = vcmask 523264  }
  0x16   : > { %1429 = vset.pattern.permute.xlu0 %v1508_v1  ;;  %1304 = vmatprep.mubr.msk.f32.mxu1 %vm354_vm0, %v484_v2  ;;  %s1367_s20 = smul.u32 80, %s320_s17  ;;  %s1195_s21 = sshll.u32 %s320_s17, 6  ;;  %v486_v18 = vld [vmem:[%s1911_s3 + $0x10] sm:$0xff]  ;;  %v349_v21 = vld [vmem:[%s1910_s2 + $0x18] sm:$0xff]  ;;  %v350_v23 = vld [vmem:[%s1910_s2 + $0x20] sm:$0xff] }
  0x17   : > { %s1624_s10 = scalar_lea.vmem %s1909_s1, %s1195_s21  ;;  %749 = vperm.xlu1 %1428, %v711_v3   ;;  %v487_v22 = vld [vmem:[%s1911_s3 + $0x18] sm:$0xff]  ;;  %v488_v24 = vld [vmem:[%s1911_s3 + $0x20] sm:$0xff]  ;;  %v710_v25 = vld [vmem:[%s1912_s4 + $0x30] sm:$0xff] }
  0x18   : > { %s1629_s16 = scalar_lea.vmem %s1908_s0, %s1367_s20  ;;  %v647_v4 = vld [vmem:[%s1624_s10 + $0x38] sm:$0xff]  ;;  %v645_v19 = vld [vmem:[%s1624_s10 + $0x28] sm:$0xff]  ;;  %v646_v20 = vld [vmem:[%s1624_s10 + $0x30] sm:$0xff] }
  0x19   : > { %v345_v5 = vld [vmem:[%s1629_s16 + $0x48] sm:$0xff]  ;;  %v344_v6 = vld [vmem:[%s1629_s16 + $0x40] sm:$0xff]  ;;  %685 = vperm.xlu0 %1429, %v647_v4   ;;  %v343_v7 = vld [vmem:[%s1629_s16 + $0x38] sm:$0xff] }
  0x1a   : > { %1252 = vmatprep.subr.mxu0 %v345_v5  ;;  %1284 = vmatprep.subr.mxu1 %v345_v5  ;;  %v342_v8 = vld [vmem:[%s1629_s16 + $0x30] sm:$0xff]  ;;  %v341_v9 = vld [vmem:[%s1629_s16 + $0x28] sm:$0xff]  ;;  %v340_v10 = vld [vmem:[%s1629_s16 + $0x20] sm:$0xff] }
  0x1b   : > { %1253 = vmatpush3.msra.mxu0 %v345_v5  ;;  %1285 = vmatpush3.msra.mxu1 %v345_v5  ;;  %v339_v11 = vld [vmem:[%s1629_s16 + $0x18] sm:$0xff]  ;;  %v338_v12 = vld [vmem:[%s1629_s16 + $0x10] sm:$0xff]  ;;  %v337_v13 = vld [vmem:[%s1629_s16 + $0x8] sm:$0xff] }
  0x1c   : > { %1254 = vmatprep.subr.mxu0 %v344_v6  ;;  %1286 = vmatprep.subr.mxu1 %v344_v6  ;;  %v336_v14 = vld [vmem:[%s1629_s16] sm:$0xff]  ;;  %v351_v27 = vld [vmem:[%s1910_s2 + $0x28] sm:$0xff]  ;;  %v352_v29 = vld [vmem:[%s1910_s2 + $0x30] sm:$0xff]  ;;  %s1510_s16 = smov [#allocation2]  }
  0x1d   : > { %1255 = vmatpush3.msra.mxu0 %v344_v6  ;;  %1287 = vmatpush3.msra.mxu1 %v344_v6  ;;  %v644_v26 = vld [vmem:[%s1624_s10 + $0x20] sm:$0xff]  ;;  %v489_v28 = vld [vmem:[%s1911_s3 + $0x28] sm:$0xff]  ;;  %v490_v30 = vld [vmem:[%s1911_s3 + $0x30] sm:$0xff]  ;;  %s1434_s17 = sshll.u32 %s1510_s16, 4  ;;  %s1435_s17 = int_to_ptr.vmem [resolvable:$false] %s1434_s17 }
  0x1e   : > { %1256 = vmatprep.subr.mxu0 %v343_v7  ;;  %1288 = vmatprep.subr.mxu1 %v343_v7  ;;  %v643_v31 = vld [vmem:[%s1624_s10 + $0x18] sm:$0xff]  ;;  %v709_v32 = vld [vmem:[%s1912_s4 + $0x28] sm:$0xff]  ;;  %v708_v35 = vld [vmem:[%s1912_s4 + $0x20] sm:$0xff]  ;;  %s1436_s18 = scalar_lea.vmem %s1435_s17, 3072 }
  0x1f   : > { %1257 = vmatpush3.msra.mxu0 %v343_v7  ;;  %1289 = vmatpush3.msra.mxu1 %v343_v7  ;;  %v353_v33 = vld [vmem:[%s1910_s2 + $0x38] sm:$0xff]  ;;  %v642_v36 = vld [vmem:[%s1624_s10 + $0x10] sm:$0xff]  ;;  %v641_v37 = vld [vmem:[%s1624_s10 + $0x8] sm:$0xff] }
  0x20   : > { %1258 = vmatprep.subr.mxu0 %v342_v8  ;;  %1290 = vmatprep.subr.mxu1 %v342_v8  ;;  %v491_v34 = vld [vmem:[%s1911_s3 + $0x38] sm:$0xff]  ;;  %v706_v39 = vld [vmem:[%s1912_s4 + $0x10] sm:$0xff]  ;;  %v640_v48 = vld [vmem:[%s1624_s10] sm:$0xff]  ;;  %s1853_s10 = scalar_lea.hbm %s1915_s7, %s1368_s23 }
  0x21   : > { %1259 = vmatpush3.msra.mxu0 %v342_v8  ;;  %1291 = vmatpush3.msra.mxu1 %v342_v8  ;;  %v707_v38 = vld [vmem:[%s1912_s4 + $0x18] sm:$0xff]  ;;  %v705_v49 = vld [vmem:[%s1912_s4 + $0x8] sm:$0xff]  ;;  %v704_v50 = vld [vmem:[%s1912_s4] sm:$0xff] }
  0x22   : > { %1260 = vmatprep.subr.mxu0 %v341_v9  ;;  %1292 = vmatprep.subr.mxu1 %v341_v9  ;;  %v796_v51 = vld [vmem:[%s1914_s6] sm:$0xff]  ;;  %v790_v53 = vld [vmem:[%s1913_s5 + $0x30] sm:$0xff]  ;;  %v797_v54 = vld [vmem:[%s1914_s6 + $0x8] sm:$0xff] }
  0x23   : > { %1261 = vmatpush3.msra.mxu0 %v341_v9  ;;  %1293 = vmatpush3.msra.mxu1 %v341_v9  ;;  %v784_v52 = vld [vmem:[%s1913_s5] sm:$0xff]  ;;  %v798_v55 = vld [vmem:[%s1914_s6 + $0x10] sm:$0xff]  ;;  %v799_v56 = vld [vmem:[%s1914_s6 + $0x18] sm:$0xff] }
  0x24   : > { %1262 = vmatprep.subr.mxu0 %v340_v10  ;;  %1294 = vmatprep.subr.mxu1 %v340_v10  ;;  %v800_v57 = vld [vmem:[%s1914_s6 + $0x20] sm:$0xff]  ;;  %v801_v58 = vld [vmem:[%s1914_s6 + $0x28] sm:$0xff]  ;;  %v802_v59 = vld [vmem:[%s1914_s6 + $0x30] sm:$0xff] }
  0x25   : > { %1263 = vmatpush3.msra.mxu0 %v340_v10  ;;  %1295 = vmatpush3.msra.mxu1 %v340_v10  ;;  %v803_v60 = vld [vmem:[%s1914_s6 + $0x38] sm:$0xff]  ;;  %v804_v61 = vld [vmem:[%s1914_s6 + $0x40] sm:$0xff]  ;;  %v805_v62 = vld [vmem:[%s1914_s6 + $0x48] sm:$0xff] }
  0x26   : > { %1264 = vmatprep.subr.mxu0 %v339_v11  ;;  %1296 = vmatprep.subr.mxu1 %v339_v11  ;;  %v806_v63 = vld [vmem:[%s1914_s6 + $0x50] sm:$0xff]  ;;  %v807_v0 = vld [vmem:[%s1914_s6 + $0x58] sm:$0xff] }
  0x27   : > { %1265 = vmatpush3.msra.mxu0 %v339_v11  ;;  %1297 = vmatpush3.msra.mxu1 %v339_v11 }
  0x28   : > { %1266 = vmatprep.subr.mxu0 %v338_v12  ;;  %1298 = vmatprep.subr.mxu1 %v338_v12 }
  0x29   : > { %1267 = vmatpush3.msra.mxu0 %v338_v12  ;;  %1299 = vmatpush3.msra.mxu1 %v338_v12 }
  0x2a   : > { %1268 = vmatprep.subr.mxu0 %v337_v13  ;;  %1300 = vmatprep.subr.mxu1 %v337_v13 }
  0x2b   : > { %1269 = vmatpush3.msra.mxu0 %v337_v13  ;;  %1301 = vmatpush3.msra.mxu1 %v337_v13 }
  0x2c   : > { %1270 = vmatprep.subr.mxu0 %v336_v14  ;;  %1302 = vmatprep.subr.mxu1 %v336_v14 }
  0x2d   : > { %1271 = vmatpush3.msra.mxu0 %v336_v14  ;;  %1303 = vmatpush3.msra.mxu1 %v336_v14 }
  0x2e   : > { %1273 = vmatmul.mubr.msk.f32.vlgmr.msra.gmra.mxu0 %vm354_vm0, %v347_v15  ;;  %1305 = vmatmul.mubr.msk.f32.vlgmr.msra.gmra.mxu1 %vm354_vm0, %v485_v16 }
  0x2f   : > { %1275 = vmatprep.mubr.msk.f32.mxu0 %vm354_vm0, %v348_v17  ;;  %1307 = vmatprep.mubr.msk.f32.mxu1 %vm354_vm0, %v486_v18  ;;  %v637_v17 = vlaneseq }
  0x30   : > { %675 = vperm.xlu1 %1428, %v645_v19   ;;  %680 = vperm.xlu0 %1429, %v646_v20  }
  0x31   : > { %v1774_v20 = vand.u32 127, %v637_v17  ;;  %v788_v17 = vld [vmem:[%s1913_s5 + $0x20] sm:$0xff] }
  0x32   : > { %1276 = vmatmul.mubr.msk.f32.gmra.mxu0 %vm354_vm0, %v349_v21  ;;  %1308 = vmatmul.mubr.msk.f32.gmra.mxu1 %vm354_vm0, %v487_v22 }
  0x33   : > { %1278 = vmatprep.mubr.msk.f32.mxu0 %vm354_vm0, %v350_v23  ;;  %1310 = vmatprep.mubr.msk.f32.mxu1 %vm354_vm0, %v488_v24  ;;  %vm639_vm2 = vcmp.eq.s32.totalorder %v1774_v20, 0  ;;  %v795_v20 = vld [vmem:[%s1913_s5 + $0x58] sm:$0xff] }
  0x34   : > { %744 = vperm.xlu1 %1428, %v710_v25   ;;  %670 = vperm.xlu0 %1429, %v644_v26  }
  0x36   : > { %1279 = vmatmul.mubr.msk.f32.gmra.mxu0 %vm354_vm0, %v351_v27  ;;  %1311 = vmatmul.mubr.msk.f32.gmra.mxu1 %vm354_vm0, %v489_v28 }
  0x37   : > { %1281 = vmatprep.mubr.msk.f32.mxu0 %vm354_vm0, %v352_v29  ;;  %1313 = vmatprep.mubr.msk.f32.mxu1 %vm354_vm0, %v490_v30 }
  0x38   : > { %665 = vperm.xlu1 %1428, %v643_v31   ;;  %739 = vperm.xlu0 %1429, %v709_v32  }
  0x3a   : > { %1282 = vmatmul.mubr.msk.f32.gmra.mxu0 %vm354_vm0, %v353_v33  ;;  %1314 = vmatmul.mubr.msk.f32.gmra.mxu1 %vm354_vm0, %v491_v34 }
  0x3b   : > { %1332 = vmatprep.mubr.msk.f32.mxu0 %vm868_vm1, %v784_v52  ;;  %1341 = vmatprep.mubr.msk.f32.mxu1 %vm868_vm1, %v790_v53 }
  0x3c   : > { %734 = vperm.xlu1 %1428, %v708_v35   ;;  %660 = vperm.xlu0 %1429, %v642_v36  }
  0x40   : > { %655 = vperm.xlu1 %1428, %v641_v37   ;;  %729 = vperm.xlu0 %1429, %v707_v38  }
  0x44   : > { %724 = vperm.xlu1 %1428, %v706_v39  }
  0x92   : > { %v750_v1 = vpop.permute.xlu1 %749 }
  0x94   : > { %v686_v2 = vpop.permute.xlu0 %685 }
  0xab   : > { %v676_v3 = vpop.permute.xlu1 %675  ;;  %v681_v4 = vpop.permute.xlu0 %680 }
  0xaf   : > { %v745_v5 = vpop.permute.xlu1 %744  ;;  %v671_v6 = vpop.permute.xlu0 %670 }
  0xb3   : > { %v666_v8 = vpop.permute.xlu1 %665  ;;  %v740_v9 = vpop.permute.xlu0 %739 }
  0xb7   : > { %v735_v12 = vpop.permute.xlu1 %734  ;;  %v661_v13 = vpop.permute.xlu0 %660 }
  0xbb   : > { %v656_v15 = vpop.permute.xlu1 %655  ;;  %v730_v16 = vpop.permute.xlu0 %729 }
  0xbf   : > { %v725_v22 = vpop.permute.xlu1 %724 }
  0xee   : > { %v1274_v40 = vpop.f32.mrf.mxu0  ;;  %v1770_v7 = vpop.f32.mrf.mxu1 }
  0xf0   : > { %v445_v41 = vpop.f32.mrf.mxu0  ;;  %v1772_v10 = vpop.f32.mrf.mxu1 }
  0xf2   : > { %v1277_v42 = vpop.f32.mrf.mxu0  ;;  %v1309_v11 = vpop.f32.mrf.mxu1 }
  0xf3   : > { %627 = vrot.lane.b32.xlu0 %v1277_v42, %s1509_s19 }
  0xf4   : > { %v455_v43 = vpop.f32.mrf.mxu0  ;;  %v592_v14 = vpop.f32.mrf.mxu1 }
  0xf6   : > { %v1280_v44 = vpop.f32.mrf.mxu0  ;;  %v1312_v18 = vpop.f32.mrf.mxu1 }
  0xf7   : > { %631 = vrot.lane.b32.xlu0 %v1280_v44, %s1509_s19 }
  0xf8   : > { %v465_v45 = vpop.f32.mrf.mxu0  ;;  %v602_v21 = vpop.f32.mrf.mxu1 }
  0xf9   : > { %629 = vrot.lane.b32.xlu1 %v465_v45, %s1509_s19 }
  0xfa   : > { %v1283_v46 = vpop.f32.mrf.mxu0  ;;  %v1315_v25 = vpop.f32.mrf.mxu1 }
  0xfb   : > { %635 = vrot.lane.b32.xlu0 %v1283_v46, %s1509_s19 }
  0xfc   : > { %v475_v47 = vpop.f32.mrf.mxu0  ;;  %v612_v32 = vpop.f32.mrf.mxu1 }
  0xfd   : > { %633 = vrot.lane.b32.xlu1 %v475_v47, %s1509_s19 }
  0xff   : > { %650 = vperm.xlu0 %1429, %v640_v48  }
 0x101   : > { %625 = vrot.lane.b32.xlu1 %v455_v43, %s1509_s19 }
 0x103   : > { %719 = vperm.xlu0 %1429, %v705_v49  }
 0x105   : > { %623 = vrot.lane.b32.xlu1 %v1274_v40, %s1509_s19 }
 0x107   : > { %714 = vperm.xlu0 %1429, %v704_v50  }
 0x109   : > { %621 = vrot.lane.b32.xlu1 %v445_v41, %s1509_s19  ;;  %s316_s19 = sand.u32 1, %s1490_s25  }
 0x10a   : > { %s1366_s21 = smul.u32 96, %s316_s19  ;;  %s1863_s12 = scalar_lea.sflag [#allocation3], %s316_s19 }
 0x10b   : > { %810 = vperm.xlu0 %1429, %v796_v51  }
 0x10c   : > { %s1838_s22 = scalar_lea.vmem [#allocation2], %s1366_s21 }
 0x10d   : > { %815 = vperm.xlu1 %1428, %v797_v54   ;;  %s1057_s30 = sshll.u32 %s1838_s22, 4  ;;  %s1857_s30 = int_to_ptr.vmem [resolvable:$true] %s1057_s30 }
 0x10e   : > { %s1430_s15 = scalar_lea.vmem %s1857_s30, 1536  ;;  %p1437_p1 = scmp.lt.s32.totalorder %s1857_s30, %s1435_s17 }
 0x10f   : > { %820 = vperm.xlu0 %1429, %v798_v55   ;;  %p1431_p12 = scmp.ne.s32.totalorder %s1857_s30, %s1430_s15  ;;  %p1438_p2 = scmp.lt.s32.totalorder %s1436_s18, %s1430_s15 }
 0x111   : > { %825 = vperm.xlu1 %1428, %v799_v56   ;;  %p1432_p13 = pnand %p1431_p12, %p1593_p4  ;;  %p1439_p3 = por %p1438_p2, %p1437_p1 }
 0x113   : > { %830 = vperm.xlu0 %1429, %v800_v57   ;;  %p1433_p0 = pneg %p1432_p13 }
 0x115   : > { %835 = vperm.xlu1 %1428, %v801_v58   ;;  %p1440_p5 = pnand %p1439_p3, %p1433_p0 }
 0x117   : > { %840 = vperm.xlu0 %1429, %v802_v59  }
 0x119   : > { %845 = vperm.xlu1 %1428, %v803_v60  }
 0x11b   : > { %850 = vperm.xlu0 %1429, %v804_v61  }
 0x11d   : > { %855 = vperm.xlu1 %1428, %v805_v62  }
 0x11f   : > { %860 = vperm.xlu0 %1429, %v806_v63  }
 0x121   : > { %865 = vperm.xlu1 %1428, %v807_v0  }
 0x165   : > { %v628_v19 = vpop.permute.xlu0 %627 }
 0x166   : > { %v691_v29 = vsel %vm639_vm2, %v666_v8, %v628_v19  ;;  %v789_v19 = vld [vmem:[%s1913_s5 + $0x28] sm:$0xff] }
 0x167   : > { %v699_v36 = vadd.f32 %v1309_v11, %v691_v29 }
 0x169   : > { %v632_v23 = vpop.permute.xlu0 %631  ;;  %v755_v45 = vadd.f32 %v730_v16, %v699_v36  ;;  %v793_v16 = vld [vmem:[%s1913_s5 + $0x48] sm:$0xff] }
 0x16a   : > { %v693_v24 = vsel %vm639_vm2, %v676_v3, %v632_v23 }
 0x16b   : > { %v630_v26 = vpop.permute.xlu1 %629  ;;  %v701_v27 = vadd.f32 %v1312_v18, %v693_v24  ;;  %v771_v55 = vmul.f32 0.01, %v755_v45  ;;  %vm763_vm7 = vcmp.gt.f32.partialorder %v755_v45, 0.0  ;;  %v794_v18 = vld [vmem:[%s1913_s5 + $0x50] sm:$0xff] }
 0x16c   : > { %v692_v28 = vsel %vm639_vm2, %v671_v6, %v630_v26 }
 0x16d   : > { %v636_v30 = vpop.permute.xlu0 %635  ;;  %v700_v33 = vadd.f32 %v692_v28, %v602_v21  ;;  %v757_v37 = vadd.f32 %v740_v9, %v701_v27  ;;  %v779_v63 = vsel %vm763_vm7, %v755_v45, %v771_v55 }
 0x16e   : > { %v695_v31 = vsel %vm639_vm2, %v686_v2, %v636_v30 }
 0x16f   : > { %v703_v34 = vadd.f32 %v1315_v25, %v695_v31  ;;  %v634_v35 = vpop.permute.xlu1 %633  ;;  %v756_v41 = vadd.f32 %v735_v12, %v700_v33  ;;  %v773_v46 = vmul.f32 0.01, %v757_v37  ;;  %vm765_vm5 = vcmp.gt.f32.partialorder %v757_v37, 0.0  ;;  %v785_v12 = vld [vmem:[%s1913_s5 + $0x8] sm:$0xff] }
 0x170   : > { %v694_v38 = vsel %vm639_vm2, %v681_v4, %v634_v35 }
 0x171   : > { %v759_v39 = vadd.f32 %v750_v1, %v703_v34  ;;  %v702_v40 = vadd.f32 %v694_v38, %v612_v32  ;;  %v772_v51 = vmul.f32 0.01, %v756_v41  ;;  %vm764_vm6 = vcmp.gt.f32.partialorder %v756_v41, 0.0 }
 0x172   : > { %v781_v56 = vsel %vm765_vm5, %v757_v37, %v773_v46 }
 0x173   : > { %v775_v42 = vmul.f32 0.01, %v759_v39  ;;  %v758_v43 = vadd.f32 %v745_v5, %v702_v40  ;;  %v626_v44 = vpop.permute.xlu1 %625  ;;  %vm767_vm3 = vcmp.gt.f32.partialorder %v759_v39, 0.0  ;;  %v780_v60 = vsel %vm764_vm6, %v756_v41, %v772_v51 }
 0x174   : > { %v690_v47 = vsel %vm639_vm2, %v661_v13, %v626_v44  ;;  %v791_v13 = vld [vmem:[%s1913_s5 + $0x38] sm:$0xff] }
 0x175   : > { %v774_v48 = vmul.f32 0.01, %v758_v43  ;;  %v698_v49 = vadd.f32 %v690_v47, %v592_v14  ;;  %v783_v50 = vsel %vm767_vm3, %v759_v39, %v775_v42  ;;  %vm766_vm4 = vcmp.gt.f32.partialorder %v758_v43, 0.0  ;;  %v792_v14 = vld [vmem:[%s1913_s5 + $0x40] sm:$0xff] }
 0x176   : > { %1316 = vmatprep.subr.mxu0 %v783_v50  ;;  %1350 = vmatprep.subr.mxu1 %v783_v50 }
 0x177   : > { %v754_v52 = vadd.f32 %v725_v22, %v698_v49  ;;  %1317 = vmatpush3.msra.mxu0 %v783_v50  ;;  %1358 = vmatpush3.msra.mxu1 %v783_v50  ;;  %v624_v53 = vpop.permute.xlu1 %623  ;;  %v782_v54 = vsel %vm766_vm4, %v758_v43, %v774_v48 }
 0x178   : > { %1318 = vmatprep.subr.mxu0 %v782_v54  ;;  %1351 = vmatprep.subr.mxu1 %v782_v54  ;;  %v689_v57 = vsel %vm639_vm2, %v656_v15, %v624_v53  ;;  %v787_v15 = vld [vmem:[%s1913_s5 + $0x18] sm:$0xff] }
 0x179   : > { %1319 = vmatpush3.msra.mxu0 %v782_v54  ;;  %1359 = vmatpush3.msra.mxu1 %v782_v54  ;;  %v770_v61 = vmul.f32 0.01, %v754_v52  ;;  %vm762_vm8 = vcmp.gt.f32.partialorder %v754_v52, 0.0  ;;  %v697_v62 = vadd.f32 %v1770_v7, %v689_v57 }
 0x17a   : > { %v651_v58 = vpop.permute.xlu0 %650  ;;  %1320 = vmatprep.subr.mxu0 %v781_v56  ;;  %1352 = vmatprep.subr.mxu1 %v781_v56 }
 0x17b   : > { %1321 = vmatpush3.msra.mxu0 %v781_v56  ;;  %1360 = vmatpush3.msra.mxu1 %v781_v56  ;;  %v622_v59 = vpop.permute.xlu1 %621  ;;  %v778_v3 = vsel %vm762_vm8, %v754_v52, %v770_v61 }
 0x17c   : > { %1322 = vmatprep.subr.mxu0 %v780_v60  ;;  %1353 = vmatprep.subr.mxu1 %v780_v60  ;;  %v688_v0 = vsel %vm639_vm2, %v651_v58, %v622_v59 }
 0x17d   : > { %1323 = vmatpush3.msra.mxu0 %v780_v60  ;;  %1361 = vmatpush3.msra.mxu1 %v780_v60  ;;  %v696_v5 = vadd.f32 %v688_v0, %v1772_v10  ;;  %v786_v10 = vld [vmem:[%s1913_s5 + $0x10] sm:$0xff] }
 0x17e   : > { %v720_v1 = vpop.permute.xlu0 %719  ;;  %1324 = vmatprep.subr.mxu0 %v779_v63  ;;  %1354 = vmatprep.subr.mxu1 %v779_v63 }
 0x17f   : > { %v753_v2 = vadd.f32 %v720_v1, %v697_v62  ;;  %1325 = vmatpush3.msra.mxu0 %v779_v63  ;;  %1362 = vmatpush3.msra.mxu1 %v779_v63 }
 0x180   : > { %1326 = vmatprep.subr.mxu0 %v778_v3  ;;  %1355 = vmatprep.subr.mxu1 %v778_v3 }
 0x181   : > { %vm761_vm9 = vcmp.gt.f32.partialorder %v753_v2, 0.0  ;;  %v769_v4 = vmul.f32 0.01, %v753_v2  ;;  %1327 = vmatpush3.msra.mxu0 %v778_v3  ;;  %1363 = vmatpush3.msra.mxu1 %v778_v3 }
 0x182   : > { %v715_v6 = vpop.permute.xlu0 %714 }
 0x183   : > { %v752_v7 = vadd.f32 %v715_v6, %v696_v5  ;;  %v777_v8 = vsel %vm761_vm9, %v753_v2, %v769_v4 }
 0x184   : > { %1328 = vmatprep.subr.mxu0 %v777_v8  ;;  %1356 = vmatprep.subr.mxu1 %v777_v8 }
 0x185   : > { %vm760_vm10 = vcmp.gt.f32.partialorder %v752_v7, 0.0  ;;  %v768_v9 = vmul.f32 0.01, %v752_v7  ;;  %1329 = vmatpush3.msra.mxu0 %v777_v8  ;;  %1364 = vmatpush3.msra.mxu1 %v777_v8 }
 0x186   : > { %v811_v22 = vpop.permute.xlu0 %810 }
 0x187   : > { %v776_v11 = vsel %vm760_vm10, %v752_v7, %v768_v9 }
 0x188   : > { %1330 = vmatprep.subr.mxu0 %v776_v11  ;;  %1357 = vmatprep.subr.mxu1 %v776_v11  ;;  %v816_v21 = vpop.permute.xlu1 %815 }
 0x189   : > { %1331 = vmatpush3.msra.mxu0 %v776_v11  ;;  %1365 = vmatpush3.msra.mxu1 %v776_v11 }
 0x18a   : > { %1333 = vmatmul.mubr.msk.f32.vlgmr.msra.gmra.mxu0 %vm868_vm1, %v785_v12  ;;  %1342 = vmatmul.mubr.msk.f32.vlgmr.msra.gmra.mxu1 %vm868_vm1, %v791_v13  ;;  %v821_v24 = vpop.permute.xlu0 %820 }
 0x18b   : > { %1335 = vmatprep.mubr.msk.f32.mxu0 %vm868_vm1, %v786_v10  ;;  %1344 = vmatprep.mubr.msk.f32.mxu1 %vm868_vm1, %v792_v14 }
 0x18c   : > { %v826_v23 = vpop.permute.xlu1 %825 }
 0x18e   : > { %1336 = vmatmul.mubr.msk.f32.gmra.mxu0 %vm868_vm1, %v787_v15  ;;  %1345 = vmatmul.mubr.msk.f32.gmra.mxu1 %vm868_vm1, %v793_v16  ;;  %v831_v26 = vpop.permute.xlu0 %830 }
 0x18f   : > { %1338 = vmatprep.mubr.msk.f32.mxu0 %vm868_vm1, %v788_v17  ;;  %1347 = vmatprep.mubr.msk.f32.mxu1 %vm868_vm1, %v794_v18 }
 0x190   : > { %v836_v25 = vpop.permute.xlu1 %835 }
 0x192   : > { %1339 = vmatmul.mubr.msk.f32.gmra.mxu0 %vm868_vm1, %v789_v19  ;;  %1348 = vmatmul.mubr.msk.f32.gmra.mxu1 %vm868_vm1, %v795_v20  ;;  %v841_v28 = vpop.permute.xlu0 %840 }
 0x194   : > { %v846_v27 = vpop.permute.xlu1 %845 }
 0x196   : > { %v851_v36 = vpop.permute.xlu0 %850 }
 0x198   : > { %v856_v31 = vpop.permute.xlu1 %855 }
 0x19a   : > { %v861_v50 = vpop.permute.xlu0 %860 }
 0x19c   : > { %v866_v45 = vpop.permute.xlu1 %865 }
 0x24a   : > { %v1334_v29 = vpop.f32.mrf.mxu0  ;;  %v1343_v30 = vpop.f32.mrf.mxu1 }
 0x24b   : > { %v977_v32 = vadd.f32 %v1334_v29, %v816_v21  ;;  %v1007_v33 = vadd.f32 %v1343_v30, %v846_v27 }
 0x24c   : > { %v971_v34 = vpop.f32.mrf.mxu0  ;;  %v1001_v35 = vpop.f32.mrf.mxu1 }
 0x24d   : > { %1031 = vst [vmem:[%s1838_s22 + $0x8] sm:$0xff] %v977_v32  ;;  %1037 = vst [vmem:[%s1838_s22 + $0x38] sm:$0xff] %v1007_v33  ;;  %v972_v37 = vadd.f32 %v971_v34, %v811_v22  ;;  %v1002_v38 = vadd.f32 %v1001_v35, %v841_v28 }
 0x24e   : > { %v1337_v39 = vpop.f32.mrf.mxu0  ;;  %v1346_v40 = vpop.f32.mrf.mxu1 }
 0x24f   : > { %1030 = vst [vmem:[%s1838_s22] sm:$0xff] %v972_v37  ;;  %1036 = vst [vmem:[%s1838_s22 + $0x30] sm:$0xff] %v1002_v38  ;;  %v987_v41 = vadd.f32 %v1337_v39, %v826_v23  ;;  %v1017_v42 = vadd.f32 %v1346_v40, %v856_v31 }
 0x250   : > { %v981_v43 = vpop.f32.mrf.mxu0  ;;  %v1011_v44 = vpop.f32.mrf.mxu1 }
 0x251   : > { %1033 = vst [vmem:[%s1838_s22 + $0x18] sm:$0xff] %v987_v41  ;;  %1039 = vst [vmem:[%s1838_s22 + $0x48] sm:$0xff] %v1017_v42  ;;  %v982_v46 = vadd.f32 %v981_v43, %v821_v24  ;;  %v1012_v47 = vadd.f32 %v1011_v44, %v851_v36 }
 0x252   : > { %v1340_v48 = vpop.f32.mrf.mxu0  ;;  %v1349_v49 = vpop.f32.mrf.mxu1 }
 0x253   : > { %1032 = vst [vmem:[%s1838_s22 + $0x10] sm:$0xff] %v982_v46  ;;  %1038 = vst [vmem:[%s1838_s22 + $0x40] sm:$0xff] %v1012_v47  ;;  %v997_v51 = vadd.f32 %v1340_v48, %v836_v25  ;;  %v1027_v52 = vadd.f32 %v1349_v49, %v866_v45 }
 0x254   : > { %v991_v53 = vpop.f32.mrf.mxu0  ;;  %v1021_v54 = vpop.f32.mrf.mxu1 }
 0x255   : > { %1035 = vst [vmem:[%s1838_s22 + $0x28] sm:$0xff] %v997_v51  ;;  %1041 = vst [vmem:[%s1838_s22 + $0x58] sm:$0xff] %v1027_v52  ;;  %v992_v55 = vadd.f32 %v991_v53, %v831_v26  ;;  %v1022_v56 = vadd.f32 %v1021_v54, %v861_v50 }
 0x257   : > { %1034 = vst [vmem:[%s1838_s22 + $0x20] sm:$0xff] %v992_v55  ;;  %1040 = vst [vmem:[%s1838_s22 + $0x50] sm:$0xff] %v1022_v56 }
 0x258   : > { %1443 = shalt.err (!%p1440_p5)
}
 0x259   : > { %s1444_s20 = scalar_lea.hbm %s1853_s10, 1536  ;;  %s1448_s22 = scalar_lea.hbm %s1915_s7, 3072 }
 0x25a   : > { %p1445_p6 = scmp.ne.s32.totalorder %s1853_s10, %s1444_s20  ;;  %p1449_p10 = scmp.lt.s32.totalorder %s1853_s10, %s1915_s7 }
 0x25b   : > { %p1450_p11 = scmp.lt.s32.totalorder %s1448_s22, %s1444_s20 }
 0x25c   : > { %p1446_p7 = pnand %p1445_p6, %p1593_p4 }
 0x25d   : > { %p1451_p12 = por %p1450_p11, %p1449_p10 }
 0x25e   : > { %p1447_p9 = pneg %p1446_p7 }
 0x260   : > { %p1452_p13 = pnand %p1451_p12, %p1447_p9 }
 0x262   : > { %1455 = shalt.err (!%p1452_p13)
}
 0x263   : > { %s1511_s8 = smov 128   ;;  %s1512_s15 = smov 8  }
 0x264   : > { %1369 = dma.vmem_to_hbm [thread:$0]  (%p1593_p4), %s1857_s30, 1536, %s1853_s10, %s1863_s12, %s1511_s8, %s1511_s8, %s1512_s15  }
 0x265 PF: > { %p1375_p0 = scmp.ge.s32.totalorder %s1506_s29, 2  ;;  %s1072_s16 = sand.u32 1, %s1486_s24  }
 0x266   : > { %s1073_s17 = scalar_lea.sflag [#allocation3], %s1072_s16 }
 0x267   : > { %p1372_p1 = pnand %p1375_p0, %p1600_p8 }
 0x269   : > { %p1373_p2 = pneg %p1372_p1 }
 0x26b   : > { %1481 = dma.done.wait (%p1373_p2), %s1073_s17, 1536  }
 0x26c   : > { %1483 = vsyncadd (%p1373_p2), %s1073_s17, 4294965760  ;;  %s20_s29 = sadd.s32 1, %s1506_s29   ;;  %s1918_s24 = smov %s1490_s25 }
 0x26d   : > { %p17_p3 = scmp.ge.s32.totalorder %s20_s29, 4   ;;  %s1919_s25 = smov %s1494_s26 }
 0x26e   : > { %s1920_s26 = smov %s1606_s14  ;;  %s1921_s27 = smov %s1502_s28 }
 0x26f   : > { %s1922_s28 = smov %s1924_s9  ;;  %19 = sbr.rel (!%p17_p3) target bundleno = 4 (0x4), region = 86 }
 0x274   :  { %1078 = vsyncpa [#allocation3], 1 }
 0x275   :  { %1080 = vsyncpa [#allocation3 + $0x1], 1 }

</bundles_post_ra>
